<compile_context>
chip_gen: v5e
topology: v5e:2x2
jax: 0.10.0
libtpu: 0.0.40
codegen_flags: <defaults>
</compile_context>

<pallas_src>
import math

import jax
import jax.numpy as jnp
from jax.experimental import pallas as pl
from jax.experimental.pallas import tpu as pltpu


def _round_up(x: int, m: int) -> int:
    return ((x + m - 1) // m) * m


def _make_policy_kernel(action_bound: float, action_dim: int):
    log_sqrt_2pi = 0.5 * math.log(2.0 * math.pi)

    def kernel(x_ref, w1_ref, b1_ref, wh_ref, eps_ref, out_ref):
        tb, out_cols = out_ref.shape

        # fc1 + ReLU.  The bias-unit lane (fc1 weights 0, fc1 bias 1) becomes
        # relu(1) == 1, which carries the head biases through the next matmul.
        h = jnp.dot(x_ref[...], w1_ref[...],
                    preferred_element_type=jnp.float32) + b1_ref[...]
        h = jnp.maximum(h, 0.0)

        # Fused mu/std head matmul (single 128-lane-multiple output):
        #   lanes [0, A)  -> mu,   lanes [A, 2A) -> std pre-activation.
        heads = jnp.dot(h, wh_ref[...], preferred_element_type=jnp.float32)
        mu = heads[:, :action_dim]
        pre_std = heads[:, action_dim:2 * action_dim]

        # softplus (numerically stable)
        std = jnp.maximum(pre_std, 0.0) + jnp.log1p(jnp.exp(-jnp.abs(pre_std)))

        # Normal(mu, std).rsample() == mu + std * eps   (eps is narrow: A lanes)
        eps = eps_ref[...]
        normal_sample = mu + std * eps

        # action = tanh(sample).  The reference applies tanh AGAIN inside its
        # squash correction (log(1 - tanh(action)^2 + 1e-7)); preserved exactly.
        action = jnp.tanh(normal_sample)
        t = jnp.tanh(action)

        # Normal(mu, std).log_prob(sample) with the squash correction.
        # (sample - mu) == std*eps exactly -> quadratic term is -0.5*eps^2, and
        # the two logs are merged into one EUP pass.
        log_prob = (-0.5 * (eps * eps) - log_sqrt_2pi
                    - jnp.log(std * (1.0 - t * t + 1e-07)))

        # Assemble one lane-dense row [action*bound | log_prob | zeros] and do a
        # single full-width unmasked store.
        parts = [action * action_bound, log_prob]
        fill = out_cols - 2 * action_dim
        if fill > 0:
            parts.append(jnp.zeros((tb, fill), jnp.float32))
        out_ref[...] = jnp.concatenate(parts, axis=-1)

    return kernel


def pack_params(params, state_dim: int, hidden_dim: int, action_dim: int):
    """Pad / fuse raw (w1,b1,w_mu,b_mu,w_std,b_std) into lane-dense packed weights."""
    w1, b1, w_mu, b_mu, w_std, b_std = params

    h_pad = _round_up(hidden_dim + 1, 128)       # +1 guarantees a spare bias-unit lane
    out_cols = _round_up(2 * action_dim, 128)    # mu | std packed side by side
    bias_idx = hidden_dim                        # first padded hidden lane = bias unit

    w1_p = jnp.zeros((state_dim, h_pad), jnp.float32).at[:, :hidden_dim].set(w1)
    b1_p = jnp.zeros((1, h_pad), jnp.float32).at[:, :hidden_dim].set(b1)
    b1_p = b1_p.at[0, bias_idx].set(1.0)         # -> h[:, bias_idx] == relu(1) == 1

    wh_p = jnp.zeros((h_pad, out_cols), jnp.float32)
    wh_p = wh_p.at[:hidden_dim, :action_dim].set(w_mu)
    wh_p = wh_p.at[:hidden_dim, action_dim:2 * action_dim].set(w_std)
    # fold head biases into the bias-unit row
    wh_p = wh_p.at[bias_idx, :action_dim].set(b_mu[0])
    wh_p = wh_p.at[bias_idx, action_dim:2 * action_dim].set(b_std[0])

    return w1_p, b1_p, wh_p


def policy_net_continuous_forward(x, packed, eps, action_bound, action_dim,
                                  *, tile_b: int = 1024):
    """Full forward pass in one Pallas call, batch-tiled along a parallel grid axis."""
    w1_p, b1_p, wh_p = packed
    batch, state_dim = x.shape
    h_pad = w1_p.shape[1]
    out_cols = wh_p.shape[1]

    # Batch tile: big enough to amortize the ~0.35us per-grid-step overhead, but
    #  * never larger than the 8-rounded batch (tiny-batch case), and
    #  * small enough that the grid has >=2 steps, so the "parallel" batch axis
    #    can shard across v7x's two TensorCores.
    # tile_b=1024 keeps per-call VMEM ~1-2 MiB (double-buffered activation tiles
    # + resident weights), well inside the 32 MiB default scoped VMEM on
    # v5e/v6e/v7x; raise vmem_limit_bytes only if you push tile_b past ~2048.
    tile_b = max(8, min(tile_b,
                        _round_up(pl.cdiv(batch, 2), 8),
                        _round_up(batch, 8)))
    batch_pad = _round_up(batch, tile_b)

    if batch_pad != batch:
        x = jnp.pad(x, ((0, batch_pad - batch), (0, 0)))
        eps = jnp.pad(eps, ((0, batch_pad - batch), (0, 0)))

    grid = (batch_pad // tile_b,)

    out = pl.pallas_call(
        _make_policy_kernel(float(action_bound), int(action_dim)),
        out_shape=jax.ShapeDtypeStruct((batch_pad, out_cols), jnp.float32),
        grid=grid,
        in_specs=[
            pl.BlockSpec((tile_b, state_dim), lambda i: (i, 0)),    # x (tiled)
            pl.BlockSpec((state_dim, h_pad), lambda i: (0, 0)),     # w1 (resident)
            pl.BlockSpec((1, h_pad), lambda i: (0, 0)),             # b1 (resident)
            pl.BlockSpec((h_pad, out_cols), lambda i: (0, 0)),      # fused heads (resident)
            pl.BlockSpec((tile_b, action_dim), lambda i: (i, 0)),   # eps (tiled, narrow)
        ],
        out_specs=pl.BlockSpec((tile_b, out_cols), lambda i: (i, 0)),
        compiler_params=pltpu.CompilerParams(dimension_semantics=("parallel",)),
    )(x, w1_p, b1_p, wh_p, eps)

    action = out[:batch, :action_dim]
    log_prob = out[:batch, action_dim:2 * action_dim]
    return action, log_prob


def init_params(key, state_dim, hidden_dim, action_dim):
    """PyTorch nn.Linear default init: U[-1/sqrt(fan_in), 1/sqrt(fan_in)]."""
    ks = jax.random.split(key, 6)

    def linear(kw, kb, fan_in, fan_out):
        bound = 1.0 / math.sqrt(fan_in)
        w = jax.random.uniform(kw, (fan_in, fan_out), jnp.float32, -bound, bound)
        b = jax.random.uniform(kb, (1, fan_out), jnp.float32, -bound, bound)
        return w, b

    w1, b1 = linear(ks[0], ks[1], state_dim, hidden_dim)
    w_mu, b_mu = linear(ks[2], ks[3], hidden_dim, action_dim)
    w_std, b_std = linear(ks[4], ks[5], hidden_dim, action_dim)
    return (w1, b1, w_mu, b_mu, w_std, b_std)


def reference_forward(x, params, eps, action_bound):
    """Pure-JAX replica of the PyTorch module (for correctness check)."""
    w1, b1, w_mu, b_mu, w_std, b_std = params
    h = jnp.maximum(x @ w1 + b1, 0.0)
    mu = h @ w_mu + b_mu
    std = jax.nn.softplus(h @ w_std + b_std)
    sample = mu + std * eps
    log_prob = (-((sample - mu) ** 2) / (2.0 * std * std)
                - jnp.log(std) - 0.5 * jnp.log(2.0 * jnp.pi))
    action = jnp.tanh(sample)
    log_prob = log_prob - jnp.log(1.0 - jnp.tanh(action) ** 2 + 1e-07)
    return action * action_bound, log_prob


if __name__ == "__main__":
    batch, state_dim, hidden_dim, action_dim = 2, 8, 32, 4
    action_bound = 2.0

    root = jax.random.PRNGKey(0)
    k_params, k_x, k_eps = jax.random.split(root, 3)

    params = init_params(k_params, state_dim, hidden_dim, action_dim)
    packed = pack_params(params, state_dim, hidden_dim, action_dim)

    x = jax.random.normal(k_x, (batch, state_dim), jnp.float32)
    eps = jax.random.normal(k_eps, (batch, action_dim), jnp.float32)

    action, log_prob = policy_net_continuous_forward(
        x, packed, eps, action_bound, action_dim)
    jax.block_until_ready((action, log_prob))

    assert action.shape == (batch, action_dim)
    assert log_prob.shape == (batch, action_dim)
    assert bool(jnp.all(jnp.isfinite(action))) and bool(jnp.all(jnp.isfinite(log_prob)))

    ref_action, ref_log_prob = reference_forward(x, params, eps, action_bound)
    assert bool(jnp.allclose(action, ref_action, rtol=1e-3, atol=1e-3))
    assert bool(jnp.allclose(log_prob, ref_log_prob, rtol=1e-3, atol=1e-3))

    print("KERNEL_OK")
</pallas_src>

<mosaic_0001>
module attributes {stable_mosaic.version = 11 : i64} {
  func.func @kernel(%arg0: i32, %arg1: memref<8x8xf32, #tpu.memory_space<vmem>>, %arg2: memref<8x128xf32, #tpu.memory_space<vmem>>, %arg3: memref<1x128xf32, #tpu.memory_space<vmem>>, %arg4: memref<128x128xf32, #tpu.memory_space<vmem>>, %arg5: memref<8x4xf32, #tpu.memory_space<vmem>>, %arg6: memref<8x128xf32, #tpu.memory_space<vmem>>) attributes {dimension_semantics = [#tpu.dimension_semantics<parallel>], iteration_bounds = array<i64: 1>, scalar_prefetch = 0 : i64, scratch_operands = 0 : i64, tpu.core_type = #tpu.core_type<tc>, window_params = [{transform_indices = @transform_0, window_bounds = array<i64: 8, 8>}, {pipeline_mode = #tpu.pipeline_mode<synchronous>, transform_indices = @transform_1, window_bounds = array<i64: 8, 128>}, {pipeline_mode = #tpu.pipeline_mode<synchronous>, transform_indices = @transform_2, window_bounds = array<i64: 1, 128>}, {pipeline_mode = #tpu.pipeline_mode<synchronous>, transform_indices = @transform_3, window_bounds = array<i64: 128, 128>}, {transform_indices = @transform_4, window_bounds = array<i64: 8, 4>}, {transform_indices = @transform_5, window_bounds = array<i64: 8, 128>}]} {
    %c0 = arith.constant 0 : index
    %c0_0 = arith.constant 0 : index
    %0 = vector.load %arg1[%c0, %c0_0] : memref<8x8xf32, #tpu.memory_space<vmem>>, vector<8x8xf32>
    %c0_1 = arith.constant 0 : index
    %c0_2 = arith.constant 0 : index
    %1 = vector.load %arg2[%c0_1, %c0_2] : memref<8x128xf32, #tpu.memory_space<vmem>>, vector<8x128xf32>
    %cst = arith.constant dense<0.000000e+00> : vector<8x128xf32>
    %2 = tpu.matmul %0, %1, %cst {dimension_numbers = #tpu.dot_dimension_numbers<[1], [0], [0], [1], [0, 0, 1, 1], [], []>} : vector<8x8xf32>, vector<8x128xf32>, vector<8x128xf32> -> vector<8x128xf32>
    %c0_3 = arith.constant 0 : index
    %c0_4 = arith.constant 0 : index
    %3 = vector.load %arg3[%c0_3, %c0_4] : memref<1x128xf32, #tpu.memory_space<vmem>>, vector<1x128xf32>
    %4 = vector.broadcast %3 : vector<1x128xf32> to vector<8x128xf32>
    %5 = arith.addf %2, %4 : vector<8x128xf32>
    %cst_5 = arith.constant 0.000000e+00 : f32
    %6 = vector.broadcast %cst_5 : f32 to vector<8x128xf32>
    %7 = arith.maximumf %5, %6 : vector<8x128xf32>
    %c0_6 = arith.constant 0 : index
    %c0_7 = arith.constant 0 : index
    %8 = vector.load %arg4[%c0_6, %c0_7] : memref<128x128xf32, #tpu.memory_space<vmem>>, vector<128x128xf32>
    %cst_8 = arith.constant dense<0.000000e+00> : vector<8x128xf32>
    %9 = tpu.matmul %7, %8, %cst_8 {dimension_numbers = #tpu.dot_dimension_numbers<[1], [0], [0], [1], [0, 0, 1, 1], [], []>} : vector<8x128xf32>, vector<128x128xf32>, vector<8x128xf32> -> vector<8x128xf32>
    %10 = vector.extract_strided_slice %9 {offsets = [0, 0], sizes = [8, 4], strides = [1, 1]} : vector<8x128xf32> to vector<8x4xf32>
    %11 = vector.extract_strided_slice %9 {offsets = [0, 4], sizes = [8, 4], strides = [1, 1]} : vector<8x128xf32> to vector<8x4xf32>
    %cst_9 = arith.constant 0.000000e+00 : f32
    %12 = vector.broadcast %cst_9 : f32 to vector<8x4xf32>
    %13 = arith.maximumf %11, %12 : vector<8x4xf32>
    %14 = math.absf %11 : vector<8x4xf32>
    %cst_10 = arith.constant 0.000000e+00 : f32
    %15 = vector.broadcast %cst_10 : f32 to vector<8x4xf32>
    %16 = arith.subf %15, %14 : vector<8x4xf32>
    %17 = math.exp %16 : vector<8x4xf32>
    %18 = math.log1p %17 : vector<8x4xf32>
    %19 = arith.addf %13, %18 : vector<8x4xf32>
    %c0_11 = arith.constant 0 : index
    %c0_12 = arith.constant 0 : index
    %20 = vector.load %arg5[%c0_11, %c0_12] : memref<8x4xf32, #tpu.memory_space<vmem>>, vector<8x4xf32>
    %21 = arith.mulf %19, %20 : vector<8x4xf32>
    %22 = arith.addf %10, %21 : vector<8x4xf32>
    %23 = math.tanh %22 : vector<8x4xf32>
    %24 = math.tanh %23 : vector<8x4xf32>
    %25 = arith.mulf %20, %20 : vector<8x4xf32>
    %cst_13 = arith.constant -5.000000e-01 : f32
    %26 = vector.broadcast %cst_13 : f32 to vector<8x4xf32>
    %27 = arith.mulf %26, %25 : vector<8x4xf32>
    %cst_14 = arith.constant 0.918938517 : f32
    %28 = vector.broadcast %cst_14 : f32 to vector<8x4xf32>
    %29 = arith.subf %27, %28 : vector<8x4xf32>
    %30 = arith.mulf %24, %24 : vector<8x4xf32>
    %cst_15 = arith.constant 1.000000e+00 : f32
    %31 = vector.broadcast %cst_15 : f32 to vector<8x4xf32>
    %32 = arith.subf %31, %30 : vector<8x4xf32>
    %cst_16 = arith.constant 1.000000e-07 : f32
    %33 = vector.broadcast %cst_16 : f32 to vector<8x4xf32>
    %34 = arith.addf %32, %33 : vector<8x4xf32>
    %35 = arith.mulf %19, %34 : vector<8x4xf32>
    %36 = math.log %35 : vector<8x4xf32>
    %37 = arith.subf %29, %36 : vector<8x4xf32>
    %cst_17 = arith.constant 2.000000e+00 : f32
    %38 = vector.broadcast %cst_17 : f32 to vector<8x4xf32>
    %39 = arith.mulf %23, %38 : vector<8x4xf32>
    %cst_18 = arith.constant 0.000000e+00 : f32
    %40 = vector.broadcast %cst_18 : f32 to vector<8x120xf32>
    %41 = tpu.concatenate %39, %37, %40 in 1 : vector<8x4xf32>, vector<8x4xf32>, vector<8x120xf32> -> vector<8x128xf32>
    %c0_19 = arith.constant 0 : index
    %c0_20 = arith.constant 0 : index
    %42 = vector.load %arg6[%c0_19, %c0_20] : memref<8x128xf32, #tpu.memory_space<vmem>>, vector<8x128xf32>
    tpu.vector_store %arg6[%c0_19, %c0_20], %41 {strides = array<i32>} : memref<8x128xf32, #tpu.memory_space<vmem>>, vector<8x128xf32>,
    return
  }
  func.func @transform_0(%arg0: i32) -> (i32, i32) {
    %c0_i32 = arith.constant 0 : i32
    %c0_i32_0 = arith.constant 0 : i32
    return %arg0, %c0_i32 : i32, i32
  }
  func.func @transform_1(%arg0: i32) -> (i32, i32) {
    %c0_i32 = arith.constant 0 : i32
    %c0_i32_0 = arith.constant 0 : i32
    %c0_i32_1 = arith.constant 0 : i32
    return %c0_i32, %c0_i32_0 : i32, i32
  }
  func.func @transform_2(%arg0: i32) -> (i32, i32) {
    %c0_i32 = arith.constant 0 : i32
    %c0_i32_0 = arith.constant 0 : i32
    %c0_i32_1 = arith.constant 0 : i32
    return %c0_i32, %c0_i32_0 : i32, i32
  }
  func.func @transform_3(%arg0: i32) -> (i32, i32) {
    %c0_i32 = arith.constant 0 : i32
    %c0_i32_0 = arith.constant 0 : i32
    %c0_i32_1 = arith.constant 0 : i32
    return %c0_i32, %c0_i32_0 : i32, i32
  }
  func.func @transform_4(%arg0: i32) -> (i32, i32) {
    %c0_i32 = arith.constant 0 : i32
    %c0_i32_0 = arith.constant 0 : i32
    return %arg0, %c0_i32 : i32, i32
  }
  func.func @transform_5(%arg0: i32) -> (i32, i32) {
    %c0_i32 = arith.constant 0 : i32
    %c0_i32_0 = arith.constant 0 : i32
    return %arg0, %c0_i32 : i32, i32
  }
}

</mosaic_0001>

<bundles_post_ra>
// kernel: tpu_custom_call.1
= control target key start
LH: loop header
LB: loop body
LE: loop exit
PB: predicated region body
PF: predicated region fallthrough
CT: control target
= control target key end

     0   :  { %10 = vsyncpa [#allocation3], 0  ;;  %s349_s0 = inlined_call_operand.vmem [shape: f32[8,8], index: 0, kind: input, shape index: {}]   ;;  %s350_s1 = inlined_call_operand.hbm [shape: f32[8,128], index: 1, kind: input, shape index: {}]   ;;  %s351_s2 = inlined_call_operand.vmem [shape: f32[1,128], index: 2, kind: input, shape index: {}]   ;;  %s352_s3 = inlined_call_operand.hbm [shape: f32[128,128], index: 3, kind: input, shape index: {}]   ;;  %s353_s4 = inlined_call_operand.vmem [shape: f32[8,4], index: 4, kind: input, shape index: {}]   ;;  %s354_s5 = inlined_call_operand.hbm [shape: f32[8,128], index: 5, kind: output, shape index: {}]  }
   0x1   :  { %11 = vsyncpa [#allocation6], 0 }
   0x2   :  { %12 = vsyncpa [#allocation4], 0  ;;  %s20_s20 = sshll.u32 %s350_s1, 4  ;;  %s289_s21 = smov [#allocation2]   ;;  %s21_s20 = int_to_ptr.hbm [resolvable:$true] %s20_s20 }
   0x3   :  { %s22_s22 = sshll.u32 %s289_s21, 4  ;;  %s32_s25 = sshll.u32 %s352_s3, 4  ;;  %s23_s22 = int_to_ptr.vmem [resolvable:$true] %s22_s22  ;;  %s33_s25 = int_to_ptr.hbm [resolvable:$true] %s32_s25 }
   0x4   :  { %25 = dma.hbm_to_vmem [thread:$0]  %s21_s20, 128, %s23_s22, [#allocation3]  }
   0x5   :  { %s290_s26 = smov [#allocation5]   ;;  %s291_s28 = smov 128  }
   0x6   :  { %s34_s27 = sshll.u32 %s290_s26, 4  ;;  %s292_s29 = smov 8   ;;  %s35_s27 = int_to_ptr.vmem [resolvable:$true] %s34_s27 }
   0x7   :  { %40 = dma.hbm_to_vmem [thread:$0]  %s33_s25, 2048, %s35_s27, [#allocation6], %s291_s28, %s291_s28, %s292_s29  }
   0x8   :  { %283 = dma.done.wait [#allocation3], 128  }
   0x9   :  { %284 = vsyncadd [#allocation3], 4294967168 }
   0xa   :  { %285 = dma.done.wait [#allocation6], 2048  }
   0xb   :  { %286 = vsyncadd [#allocation6], 4294965248  ;;  %vm57_vm0 = vcmask 64512   ;;  %v52_v0 = vld [vmem:[#allocation2] sm:$0xff]  ;;  %v96_v3 = vld [vmem:[#allocation5 + $0x70] sm:$0xff]  ;;  %s293_s6 = smov 4  }
   0xc   :  { %v51_v1 = vld [vmem:[%s349_s0] sm:$0xff]  ;;  %76 = vmatpush.msra.mxu0 %v52_v0  ;;  %v95_v4 = vld [vmem:[#allocation5 + $0x68] sm:$0xff]  ;;  %v94_v5 = vld [vmem:[#allocation5 + $0x60] sm:$0xff]  ;;  %vm169_vm2 = vcmask 31744   ;;  %s180_s12 = sshll.u32 %s354_s5, 4  ;;  %s181_s12 = int_to_ptr.hbm [resolvable:$true] %s180_s12 }
   0xd   :  { %v97_v2 = vld [vmem:[#allocation5 + $0x78] sm:$0xff]  ;;  %191 = vmatmul.msk.f32.vlgmr.msra.gmra.mxu0 %vm57_vm0, %v51_v1  ;;  %v92_v7 = vld [vmem:[#allocation5 + $0x50] sm:$0xff]  ;;  %v91_v8 = vld [vmem:[#allocation5 + $0x48] sm:$0xff] }
   0xe   :  { %98 = vmatpush.msra.mxu1 %v97_v2  ;;  %v93_v6 = vld [vmem:[#allocation5 + $0x58] sm:$0xff]  ;;  %v90_v9 = vld [vmem:[#allocation5 + $0x40] sm:$0xff]  ;;  %v88_v11 = vld [vmem:[#allocation5 + $0x30] sm:$0xff] }
   0xf   :  { %v89_v10 = vld [vmem:[#allocation5 + $0x38] sm:$0xff]  ;;  %v87_v12 = vld [vmem:[#allocation5 + $0x28] sm:$0xff]  ;;  %v86_v13 = vld [vmem:[#allocation5 + $0x20] sm:$0xff] }
  0x10   :  { %99 = vmatpush.msra.mxu1 %v96_v3  ;;  %v85_v14 = vld [vmem:[#allocation5 + $0x18] sm:$0xff]  ;;  %v84_v15 = vld [vmem:[#allocation5 + $0x10] sm:$0xff]  ;;  %v83_v16 = vld [vmem:[#allocation5 + $0x8] sm:$0xff] }
  0x11   :  { %v82_v17 = vld [vmem:[#allocation5] sm:$0xff]  ;;  %v133_v18 = vld [vmem:[%s353_s4] sm:$0xff]  ;;  %s295_s4 = smov [#allocation7]  }
  0x12   :  { %100 = vmatpush.msra.mxu1 %v95_v4  ;;  %135 = vrot.lane.b32.xlu0 %v133_v18, %s293_s6  ;;  %v200_v19 = vld [vmem:[%s351_s2] ss:$0 sm:$0xff]  ;;  %s294_s2 = smov 124   ;;  %v146_v51 = vmul.f32 %v133_v18, %v133_v18  ;;  %s178_s9 = sshll.u32 %s295_s4, 4  ;;  %s179_s9 = int_to_ptr.vmem [resolvable:$true] %s178_s9 }
  0x14   :  { %101 = vmatpush.msra.mxu1 %v94_v5  ;;  %v147_v52 = vmul.f32 -0.5, %v146_v51 }
  0x16   :  { %102 = vmatpush.msra.mxu1 %v93_v6  ;;  %v192_v53 = vadd.f32 -0.9189385, %v147_v52 }
  0x18   :  { %103 = vmatpush.msra.mxu1 %v92_v7 }
  0x1a   :  { %104 = vmatpush.msra.mxu1 %v91_v8 }
  0x1c   :  { %105 = vmatpush.msra.mxu1 %v90_v9 }
  0x1e   :  { %106 = vmatpush.msra.mxu1 %v89_v10 }
  0x20   :  { %107 = vmatpush.msra.mxu1 %v88_v11 }
  0x22   :  { %108 = vmatpush.msra.mxu1 %v87_v12 }
  0x24   :  { %109 = vmatpush.msra.mxu1 %v86_v13 }
  0x26   :  { %110 = vmatpush.msra.mxu1 %v85_v14 }
  0x28   :  { %111 = vmatpush.msra.mxu1 %v84_v15 }
  0x2a   :  { %112 = vmatpush.msra.mxu1 %v83_v16 }
  0x2c   :  { %113 = vmatpush.msra.mxu1 %v82_v17 }
  0x84   :  { %v136_v36 = vpop.permute.xlu0 %135 }
  0x8a   :  { %v78_v20 = vpop.f32.mrf.mxu0 }
  0x8b   :  { %v79_v21 = vadd.f32 %v200_v19, %v78_v20 }
  0x8d   :  { %v81_v22 = vmax.f32 %v79_v21, 0.0 }
  0x8f   :  { %114 = vmatmul.f32.vlgmr.msra.gmra.mxu1 %v81_v22 }
 0x10c   :  { %v115_v23 = vpop.f32.mrf.mxu1 }
 0x10d   :  { %v119_v24 = vand.u32 2147483647, %v115_v23  ;;  %v118_v35 = vmax.f32 %v115_v23, 0.0 }
 0x10f   :  { %v120_v25 = vsub.f32 0.0, %v119_v24 }
 0x111   :  { %v121_v26 = vmul.f32 1.442695, %v120_v25 }
 0x113   :  { %201 = vpow2.f32 %v121_v26 }
 0x119   :  { %v202_v27 = vpop.eup %201 }
 0x11a   :  { %v123_v28 = vadd.f32 1.0, %v202_v27  ;;  %v126_v29 = vmul.f32 -0.5, %v202_v27  ;;  %v129_v31 = vand.u32 2147483647, %v202_v27 }
 0x11c   :  { %203 = vlog2.f32 %v123_v28  ;;  %v127_v30 = vadd.f32 1.0, %v126_v29  ;;  %vm130_vm1 = vcmp.lt.f32.partialorder %v129_v31, 0.0004427343 }
 0x11e   :  { %v128_v34 = vmul.f32 %v202_v27, %v127_v30 }
 0x122   :  { %v204_v32 = vpop.eup %203 }
 0x123   :  { %v125_v33 = vmul.f32 0.6931472, %v204_v32 }
 0x125   :  { %v131_v37 = vsel %vm130_vm1, %v128_v34, %v125_v33 }
 0x126   :  { %v132_v38 = vadd.f32 %v131_v37, %v118_v35 }
 0x128   :  { %v138_v39 = vmul.f32 %v136_v36, %v132_v38 }
 0x12a   :  { %140 = vrot.lane.b32.xlu0 %v138_v39, %s294_s2 }
 0x19c   :  { %v141_v40 = vpop.permute.xlu0 %140 }
 0x19d   :  { %v143_v41 = vadd.f32 %v141_v40, %v115_v23 }
 0x19f   :  { %205 = vtanh.f32 %v143_v41 }
 0x1a5   :  { %v206_v42 = vpop.eup %205 }
 0x1a6   :  { %207 = vtanh.f32 %v206_v42  ;;  %v164_v56 = vmul.f32 2.0, %v206_v42 }
 0x1ac   :  { %v208_v43 = vpop.eup %207 }
 0x1ad   :  { %v149_v44 = vmul.f32 %v208_v43, %v208_v43 }
 0x1af   :  { %v150_v45 = vsub.f32 1.0, %v149_v44 }
 0x1b1   :  { %v151_v46 = vadd.f32 1e-07, %v150_v45 }
 0x1b3   :  { %153 = vrot.lane.b32.xlu1 %v151_v46, %s293_s6 }
 0x225   :  { %v154_v47 = vpop.permute.xlu1 %153 }
 0x226   :  { %v156_v48 = vmul.f32 %v154_v47, %v132_v38 }
 0x228   :  { %209 = vlog2.f32 %v156_v48 }
 0x22e   :  { %v210_v49 = vpop.eup %209 }
 0x22f   :  { %v158_v50 = vmul.f32 0.6931472, %v210_v49 }
 0x231   :  { %160 = vrot.lane.b32.xlu1 %v158_v50, %s294_s2 }
 0x2a3   :  { %v161_v54 = vpop.permute.xlu1 %160 }
 0x2a4   :  { %v163_v55 = vsub.f32 %v192_v53, %v161_v54 }
 0x2a6   :  { %166 = vrot.lane.b32.xlu2 %v163_v55, %s293_s6 }
 0x300   :  { %v167_v57 = vpop.permute.xlu2 %166 }
 0x301   :  { %v170_v58 = vsel %vm169_vm2, %v164_v56, %v167_v57 }
 0x302   :  { %v171_v59 = vsel %vm57_vm0, %v170_v58, 0.0 }
 0x303   :  { %172 = vst [vmem:[#allocation7] sm:$0xff] %v171_v59 }
 0x304   :  { %183 = dma.vmem_to_hbm [thread:$0]  %s179_s9, 128, %s181_s12, [#allocation4]  }
 0x305   :  { %287 = dma.done.wait [#allocation4], 128  }
 0x306   :  { %288 = vsyncadd [#allocation4], 4294967168 }
 0x307   :  { %188 = vsyncpa [#allocation3], 1 }
 0x308   :  { %189 = vsyncpa [#allocation6], 1 }
 0x309   :  { %190 = vsyncpa [#allocation4], 1 }

</bundles_post_ra>
